<compile_context>
chip_gen: v7x
topology: tpu7x:2x2x1
jax: 0.10.0
libtpu: 0.0.40
codegen_flags: <defaults>
</compile_context>

<pallas_src>
import jax
import jax.numpy as jnp
from jax.experimental import pallas as pl
from jax.experimental.pallas import tpu as pltpu

# ---- problem sizes (small, consistent with the module's forward) -----------
B = 2            # batch
IN_SENSORS = 16
U_D_OUT = 1
IN = IN_SENSORS * U_D_OUT   # flattened branch input dim
N = 8            # number of output query points (out_shape = (8,))
VDIN = 2         # v_d_in  (trunk input coordinate dim)
H = 32           # hidden width of both MLPs
P = 32           # DeepONet latent dimension p
O = 2            # v_d_out (output components)
SCALE = 1.0 / (P ** 0.5)    # scale == 'sqrt'

RPAD = H + 8     # 40: padded lane width of packed operands / row-block height
KAUG = RPAD      # augmented contraction width for the branch matmuls


def deeponet_kernel(u_ref, xb_ref, p_ref, out_ref):
    # p_ref packing (rows x 40 lanes):
    #   rows   0: 40  BW : branch layer-1, transposed+augmented
    #                      BW[h, i<16] = bw1[i, h], BW[h, 16] = bb1[h],
    #                      BW[32, 16]  = 1 (constant-one row), rest 0
    #   rows  40:120  BM : folded branch-layer-2 x trunk-output weights,
    #                      one 40-row block per output component o; lane 32
    #                      holds the per-o constants (scale, bb2, tb2 and the
    #                      learnable bias folded in); rest 0
    #   rows 120:123  TP : trunk layer-1 rows [tw1_0, tw1_1, tb1], padded to
    #                      40 lanes, with lane 32 of the tb1 row == 1

    # ---- branch hidden layer, transposed (batch on lanes) -------------------
    # hT[h, b] = relu(sum_i bw1[i,h] u[b,i] + bb1[h]);  hT[32, b] == 1.
    h_t = jnp.maximum(
        jnp.dot(p_ref[0:RPAD, :], u_ref[...],
                preferred_element_type=jnp.float32), 0.0)            # (40, B)

    # ---- folded per-batch weights, transposed (one MXU matmul) --------------
    # wct[h,        b] = W[b, h, o=0]      wct[32, b] = c[b, 0]
    # wct[40 + h,   b] = W[b, h, o=1]      wct[72, b] = c[b, 1]
    wct = jnp.dot(p_ref[RPAD:3 * RPAD, :], h_t,
                  preferred_element_type=jnp.float32)                 # (80, B)

    # ---- trunk hidden layer: pure VPU FMAs (coords pre-broadcast) -----------
    th = jnp.maximum(
        xb_ref[0] * p_ref[3 * RPAD:3 * RPAD + 1, :]
        + xb_ref[1] * p_ref[3 * RPAD + 1:3 * RPAD + 2, :]
        + p_ref[3 * RPAD + 2:3 * RPAD + 3, :],
        0.0)                                       # (B*N, 40), lane 32 == 1

    # ---- tail: one MXU matmul + one full-row store per batch ----------------
    for b in range(B):                             # static unroll, B = 2
        w_b = jnp.concatenate(
            [wct[0:RPAD, b:b + 1], wct[RPAD:2 * RPAD, b:b + 1]], axis=1)  # (40, O)
        out_b = jnp.dot(th[b * N:(b + 1) * N, :], w_b,
                        preferred_element_type=jnp.float32)          # (N, O)
        out_ref[b * N:(b + 1) * N, :] = out_b.astype(out_ref.dtype)


def _pack_params(params):
    """Fold branch layer 2, trunk output layer, scale and learnable bias into
    one lane-padded (128, 40) parameter array (done once per parameter set)."""
    bw1, bb1, bw2, bb2, tw1, tb1, tw2_flat, tb2_flat, out_bias = params

    tw2 = tw2_flat.reshape(H, P, O)                   # [h, p, o]
    tb2 = tb2_flat.reshape(P, O)                      # [p, o]
    # W[b,h,o] = sum_k hrelu[b,k] A[k,h,o] + C[h,o]
    # c[b,o]   = sum_k hrelu[b,k] A2[k,o]  + C2[o]
    A = SCALE * jnp.einsum('kp,hpo->kho', bw2, tw2)   # (H, H, O) over k,h,o
    C = SCALE * jnp.einsum('p,hpo->ho', bb2, tw2)     # (H, O)
    A2 = SCALE * (bw2 @ tb2)                          # (H, O)
    C2 = SCALE * (bb2 @ tb2) + out_bias               # (O,)

    # BW (40, 40): branch layer-1, transposed + bias column + constant-1 row.
    BW = jnp.zeros((RPAD, RPAD), jnp.float32)
    BW = BW.at[0:H, 0:IN].set(bw1.T)
    BW = BW.at[0:H, IN].set(bb1)
    BW = BW.at[H, IN].set(1.0)

    # BM (80, 40): per-o 40-row blocks of folded weights (h rows, k lanes).
    BM = jnp.zeros((2 * RPAD, RPAD), jnp.float32)
    for o in range(O):
        r0 = o * RPAD
        BM = BM.at[r0:r0 + H, 0:H].set(A[:, :, o].T)
        BM = BM.at[r0:r0 + H, H].set(C[:, o])
        BM = BM.at[r0 + H, 0:H].set(A2[:, o])
        BM = BM.at[r0 + H, H].set(C2[o])

    # TP (8, 40): trunk layer-1 rows + constant-1 lane (for the bias matmul).
    TP = jnp.zeros((8, RPAD), jnp.float32)
    TP = TP.at[0, 0:H].set(tw1[0])
    TP = TP.at[1, 0:H].set(tw1[1])
    TP = TP.at[2, 0:H].set(tb1)
    TP = TP.at[2, H].set(1.0)

    return jnp.concatenate([BW, BM, TP], axis=0)      # (128, 40)


def deeponet_forward(u, x_out, params):
    """u: (B, IN_SENSORS, U_D_OUT), x_out: (B, N, VDIN) -> (B, N, O)."""
    p_pack = _pack_params(params)

    # Branch input, transposed + constant-1 row (bias folded into the matmul).
    u_flat = u.reshape(B, IN)
    u_t = jnp.zeros((KAUG, B), jnp.float32)
    u_t = u_t.at[0:IN, :].set(u_flat.T)
    u_t = u_t.at[IN, :].set(1.0)

    # Query coordinates pre-broadcast to 40 lanes (layout plumbing only, ~5 KB).
    xq = x_out.reshape(B * N, VDIN)
    xb = jnp.broadcast_to(xq.T[:, :, None], (VDIN, B * N, RPAD)).astype(jnp.float32)

    # TODO(synk): for large N, add a ("parallel",) grid over row tiles of xb
    # with constant-index param BlockSpecs and a lane-dense output slab.
    vmem = pl.BlockSpec(memory_space=pltpu.MemorySpace.VMEM)
    out_flat = pl.pallas_call(
        deeponet_kernel,
        out_shape=jax.ShapeDtypeStruct((B * N, O), jnp.float32),
        in_specs=[vmem, vmem, vmem],
        out_specs=vmem,
    )(u_t, xb, p_pack)
    return out_flat.reshape(B, N, O)


def deeponet_reference(u, x_out, params):
    """Pure-JAX reference matching the PyTorch DeepONet forward semantics."""
    (bw1, bb1, bw2, bb2, tw1, tb1, tw2_flat, tb2_flat, out_bias) = params
    # branch net: (B, *in_shape, u_d_out) -> (B, p)
    u_flat = u.reshape(B, IN)
    h = jax.nn.relu(u_flat @ bw1 + bb1)
    branch_vals = h @ bw2 + bb2                                  # (B, P)
    # trunk net: (B, *out_shape, v_d_in) -> (B, *out_shape, p, v_d_out)
    xq = x_out.reshape(B * N, VDIN)
    th = jax.nn.relu(xq @ tw1 + tb1)
    trunk_vals = (th @ tw2_flat + tb2_flat).reshape(B, N, P, O)
    # einsum 'bp,b...po->b...o'
    pre_scaled = jnp.einsum('bp,bnpo->bno', branch_vals, trunk_vals)
    scaled = pre_scaled / (P ** 0.5)                             # scale == 'sqrt'
    return scaled + out_bias.reshape(1, 1, O)                    # learnable bias


def init_params(key):
    ks = jax.random.split(key, 9)
    s = 0.1
    bw1 = s * jax.random.normal(ks[0], (IN, H), jnp.float32)
    bb1 = s * jax.random.normal(ks[1], (H,), jnp.float32)
    bw2 = s * jax.random.normal(ks[2], (H, P), jnp.float32)
    bb2 = s * jax.random.normal(ks[3], (P,), jnp.float32)
    tw1 = s * jax.random.normal(ks[4], (VDIN, H), jnp.float32)
    tb1 = s * jax.random.normal(ks[5], (H,), jnp.float32)
    tw2 = s * jax.random.normal(ks[6], (H, P * O), jnp.float32)
    tb2 = s * jax.random.normal(ks[7], (P * O,), jnp.float32)
    bias = jax.random.normal(ks[8], (O,), jnp.float32)   # bias=True -> N(0,1) init
    return (bw1, bb1, bw2, bb2, tw1, tb1, tw2, tb2, bias)


if __name__ == "__main__":
    key = jax.random.PRNGKey(0)
    k_u, k_x, k_p = jax.random.split(key, 3)

    u = jax.random.normal(k_u, (B, IN_SENSORS, U_D_OUT), jnp.float32)
    x_out = jax.random.normal(k_x, (B, N, VDIN), jnp.float32)
    params = init_params(k_p)

    fwd = jax.jit(deeponet_forward)
    out = fwd(u, x_out, params)
    out = jax.block_until_ready(out)

    ref = deeponet_reference(u, x_out, params)
    assert out.shape == (B, N, O), out.shape
    assert jnp.allclose(out, ref, rtol=1e-4, atol=1e-5), (
        f"max abs err = {jnp.max(jnp.abs(out - ref))}")
    print("KERNEL_OK")
</pallas_src>

<mosaic_0001>
module attributes {stable_mosaic.version = 11 : i64} {
  func.func @deeponet_kernel(%arg0: memref<40x2xf32, #tpu.memory_space<vmem>>, %arg1: memref<2x16x40xf32, #tpu.memory_space<vmem>>, %arg2: memref<128x40xf32, #tpu.memory_space<vmem>>, %arg3: memref<16x2xf32, #tpu.memory_space<vmem>>) attributes {dimension_semantics = [], scalar_prefetch = 0 : i64, scratch_operands = 0 : i64, tpu.core_type = #tpu.core_type<tc>} {
    %c0 = arith.constant 0 : index
    %c0_0 = arith.constant 0 : index
    %0 = vector.load %arg2[%c0, %c0_0] : memref<128x40xf32, #tpu.memory_space<vmem>>, vector<40x40xf32>
    %c0_1 = arith.constant 0 : index
    %c0_2 = arith.constant 0 : index
    %1 = vector.load %arg0[%c0_1, %c0_2] : memref<40x2xf32, #tpu.memory_space<vmem>>, vector<40x2xf32>
    %cst = arith.constant dense<0.000000e+00> : vector<40x2xf32>
    %2 = tpu.matmul %0, %1, %cst {dimension_numbers = #tpu.dot_dimension_numbers<[1], [0], [0], [1], [0, 0, 1, 1], [], []>} : vector<40x40xf32>, vector<40x2xf32>, vector<40x2xf32> -> vector<40x2xf32>
    %cst_3 = arith.constant 0.000000e+00 : f32
    %3 = vector.broadcast %cst_3 : f32 to vector<40x2xf32>
    %4 = arith.maximumf %2, %3 : vector<40x2xf32>
    %c40 = arith.constant 40 : index
    %c0_4 = arith.constant 0 : index
    %5 = vector.load %arg2[%c40, %c0_4] : memref<128x40xf32, #tpu.memory_space<vmem>>, vector<80x40xf32>
    %cst_5 = arith.constant dense<0.000000e+00> : vector<80x2xf32>
    %6 = tpu.matmul %5, %4, %cst_5 {dimension_numbers = #tpu.dot_dimension_numbers<[1], [0], [0], [1], [0, 0, 1, 1], [], []>} : vector<80x40xf32>, vector<40x2xf32>, vector<80x2xf32> -> vector<80x2xf32>
    %c0_6 = arith.constant 0 : index
    %c0_7 = arith.constant 0 : index
    %c0_8 = arith.constant 0 : index
    %7 = vector.load %arg1[%c0_6, %c0_7, %c0_8] : memref<2x16x40xf32, #tpu.memory_space<vmem>>, vector<1x16x40xf32>
    %8 = vector.shape_cast %7 : vector<1x16x40xf32> to vector<16x40xf32>
    %c120 = arith.constant 120 : index
    %c0_9 = arith.constant 0 : index
    %9 = vector.load %arg2[%c120, %c0_9] : memref<128x40xf32, #tpu.memory_space<vmem>>, vector<1x40xf32>
    %10 = vector.broadcast %9 : vector<1x40xf32> to vector<16x40xf32>
    %11 = arith.mulf %8, %10 : vector<16x40xf32>
    %c1 = arith.constant 1 : index
    %c0_10 = arith.constant 0 : index
    %c0_11 = arith.constant 0 : index
    %12 = vector.load %arg1[%c1, %c0_10, %c0_11] : memref<2x16x40xf32, #tpu.memory_space<vmem>>, vector<1x16x40xf32>
    %13 = vector.shape_cast %12 : vector<1x16x40xf32> to vector<16x40xf32>
    %c121 = arith.constant 121 : index
    %c0_12 = arith.constant 0 : index
    %14 = vector.load %arg2[%c121, %c0_12] : memref<128x40xf32, #tpu.memory_space<vmem>>, vector<1x40xf32>
    %15 = vector.broadcast %14 : vector<1x40xf32> to vector<16x40xf32>
    %16 = arith.mulf %13, %15 : vector<16x40xf32>
    %17 = arith.addf %11, %16 : vector<16x40xf32>
    %c122 = arith.constant 122 : index
    %c0_13 = arith.constant 0 : index
    %18 = vector.load %arg2[%c122, %c0_13] : memref<128x40xf32, #tpu.memory_space<vmem>>, vector<1x40xf32>
    %19 = vector.broadcast %18 : vector<1x40xf32> to vector<16x40xf32>
    %20 = arith.addf %17, %19 : vector<16x40xf32>
    %cst_14 = arith.constant 0.000000e+00 : f32
    %21 = vector.broadcast %cst_14 : f32 to vector<16x40xf32>
    %22 = arith.maximumf %20, %21 : vector<16x40xf32>
    %23 = vector.extract_strided_slice %6 {offsets = [0, 0], sizes = [40, 1], strides = [1, 1]} : vector<80x2xf32> to vector<40x1xf32>
    %24 = vector.extract_strided_slice %6 {offsets = [40, 0], sizes = [40, 1], strides = [1, 1]} : vector<80x2xf32> to vector<40x1xf32>
    %25 = tpu.concatenate %23, %24 in 1 : vector<40x1xf32>, vector<40x1xf32> -> vector<40x2xf32>
    %26 = vector.extract_strided_slice %22 {offsets = [0, 0], sizes = [8, 40], strides = [1, 1]} : vector<16x40xf32> to vector<8x40xf32>
    %cst_15 = arith.constant dense<0.000000e+00> : vector<8x2xf32>
    %27 = tpu.matmul %26, %25, %cst_15 {dimension_numbers = #tpu.dot_dimension_numbers<[1], [0], [0], [1], [0, 0, 1, 1], [], []>} : vector<8x40xf32>, vector<40x2xf32>, vector<8x2xf32> -> vector<8x2xf32>
    %c0_16 = arith.constant 0 : index
    %c0_17 = arith.constant 0 : index
    %28 = vector.load %arg3[%c0_16, %c0_17] : memref<16x2xf32, #tpu.memory_space<vmem>>, vector<8x2xf32>
    tpu.vector_store %arg3[%c0_16, %c0_17], %27 {strides = array<i32>} : memref<16x2xf32, #tpu.memory_space<vmem>>, vector<8x2xf32>,
    %29 = vector.extract_strided_slice %6 {offsets = [0, 1], sizes = [40, 1], strides = [1, 1]} : vector<80x2xf32> to vector<40x1xf32>
    %30 = vector.extract_strided_slice %6 {offsets = [40, 1], sizes = [40, 1], strides = [1, 1]} : vector<80x2xf32> to vector<40x1xf32>
    %31 = tpu.concatenate %29, %30 in 1 : vector<40x1xf32>, vector<40x1xf32> -> vector<40x2xf32>
    %32 = vector.extract_strided_slice %22 {offsets = [8, 0], sizes = [8, 40], strides = [1, 1]} : vector<16x40xf32> to vector<8x40xf32>
    %cst_18 = arith.constant dense<0.000000e+00> : vector<8x2xf32>
    %33 = tpu.matmul %32, %31, %cst_18 {dimension_numbers = #tpu.dot_dimension_numbers<[1], [0], [0], [1], [0, 0, 1, 1], [], []>} : vector<8x40xf32>, vector<40x2xf32>, vector<8x2xf32> -> vector<8x2xf32>
    %c8 = arith.constant 8 : index
    %c0_19 = arith.constant 0 : index
    %34 = vector.load %arg3[%c8, %c0_19] : memref<16x2xf32, #tpu.memory_space<vmem>>, vector<8x2xf32>
    tpu.vector_store %arg3[%c8, %c0_19], %33 {strides = array<i32>} : memref<16x2xf32, #tpu.memory_space<vmem>>, vector<8x2xf32>,
    return
  }
}

</mosaic_0001>

<bundles_post_ra>
// kernel: deeponet_forward.1
= control target key start
LH: loop header
LB: loop body
LE: loop exit
PB: predicated region body
PF: predicated region fallthrough
CT: control target
= control target key end

     0   :  { %v710_v0 = vmov 0.0|0.0   ;;  %vm711_vm0 = vmmov 0   ;;  %v712_v4 = vmov 0.0   ;;  %vm24_vm1 = vcmask 326656   ;;  %s713_s24 = smov 1   ;;  %s714_s25 = smov 127   ;;  %s880_s0 = inlined_call_operand.vmem [shape: f32[40,2], index: 0, kind: input, shape index: {}]   ;;  %s881_s2 = inlined_call_operand.vmem [shape: f32[128,40], index: 2, kind: input, shape index: {}]   ;;  %s882_s1 = inlined_call_operand.vmem [shape: f32[2,16,40], index: 1, kind: input, shape index: {}]   ;;  %s883_s3 = inlined_call_operand.vmem [shape: f32[16,2], index: 3, kind: output, shape index: {}]  }
   0x1   :  { %659 = vmatprep.subr.bf16.mxu0 %v710_v0  ;;  %v19_v1 = vld [vmem:[%s880_s0] sm:$0xff]  ;;  %v20_v2 = vld [vmem:[%s880_s0 + $0x8] sm:$0xff]  ;;  %v21_v3 = vld [vmem:[%s880_s0 + $0x10] sm:$0xff]  ;;  %593 = vmatprep.mubr.msk.f32.mxu0 %vm711_vm0, %v712_v4  ;;  %vm340_vm2 = vcmask 7168   ;;  %vm419_vm3 = vcmask 15360  }
   0x2   :  { %v660_v5 = vpack.c.bf16 %v20_v2, %v19_v1  ;;  %v22_v6 = vld [vmem:[%s880_s0 + $0x18] sm:$0xff]  ;;  %v23_v8 = vld [vmem:[%s880_s0 + $0x20] sm:$0xff]  ;;  %v15_v10 = vld [vmem:[%s881_s2 + $0x8] sm:$0xff] }
   0x3   :  { %v663_v7 = vpack.c.bf16 %v22_v6, %v21_v3  ;;  %v14_v9 = vld [vmem:[%s881_s2] sm:$0xff]  ;;  %v16_v11 = vld [vmem:[%s881_s2 + $0x10] sm:$0xff]  ;;  %v17_v12 = vld [vmem:[%s881_s2 + $0x18] sm:$0xff] }
   0x4   :  { %661 = vmatpush3.bf16.msra.mxu0 %v660_v5  ;;  %v18_v13 = vld [vmem:[%s881_s2 + $0x20] sm:$0xff]  ;;  %v135_v14 = vld [vmem:[%s881_s2 + $0x28] sm:$0xff]  ;;  %v136_v32 = vld [vmem:[%s881_s2 + $0x30] sm:$0xff] }
   0x5   :  { %662 = vmatprep.subr.bf16.mxu0 %v710_v0  ;;  %618 = vmatprep.mubr.msk.f32.mxu1 %vm24_vm1, %v135_v14  ;;  %v137_v33 = vld [vmem:[%s881_s2 + $0x38] sm:$0xff]  ;;  %v138_v34 = vld [vmem:[%s881_s2 + $0x40] sm:$0xff]  ;;  %v139_v35 = vld [vmem:[%s881_s2 + $0x48] sm:$0xff] }
   0x6   :  { %v140_v36 = vld [vmem:[%s881_s2 + $0x50] sm:$0xff]  ;;  %v141_v37 = vld [vmem:[%s881_s2 + $0x58] sm:$0xff]  ;;  %v142_v38 = vld [vmem:[%s881_s2 + $0x60] sm:$0xff] }
   0x7   :  { %v143_v39 = vld [vmem:[%s881_s2 + $0x68] sm:$0xff]  ;;  %v144_v40 = vld [vmem:[%s881_s2 + $0x70] sm:$0xff]  ;;  %v290_v55 = vld [vmem:[%s882_s1] sm:$0xff] }
   0x8   :  { %664 = vmatpush3.bf16.msra.mxu0 %v663_v7  ;;  %v539_v56 = vld [vmem:[%s881_s2 + $0x78] ss:$0 sm:$0xff]  ;;  %v540_v57 = vld [vmem:[%s882_s1 + $0x10] sm:$0xff]  ;;  %v542_v58 = vld [vmem:[%s881_s2 + $0x79] ss:$0 sm:$0xff] }
   0x9   :  { %591 = vmatprep.subr.mxu0 %v712_v4  ;;  %v297_v59 = vmul.f32 %v539_v56, %v290_v55  ;;  %v307_v60 = vmul.f32 %v542_v58, %v540_v57  ;;  %v291_v61 = vld [vmem:[%s882_s1 + $0x8] sm:$0xff]  ;;  %v541_v62 = vld [vmem:[%s882_s1 + $0x18] sm:$0xff] }
   0xa   :  { %v298_v5 = vmul.f32 %v539_v56, %v291_v61  ;;  %v308_v6 = vmul.f32 %v542_v58, %v541_v62 }
   0xb   :  { %v309_v3 = vadd.f32 %v307_v60, %v297_v59 }
   0xc   :  { %592 = vmatpush3.msra.mxu0 %v23_v8 }
   0xd   :  { %594 = vmatmul.mubr.msk.f32.vlgmr.msra.gmra.mrb[0].mxu0 %vm24_vm1, %v14_v9  ;;  %673 = vmatprep.subr.bf16.mxu0 %v710_v0  ;;  %v543_v9 = vld [vmem:[%s881_s2 + $0x7a] ss:$0 sm:$0xff] }
   0xe   :  { %596 = vmatprep.mubr.msk.f32.mxu0 %vm711_vm0, %v712_v4 }
  0x11   :  { %597 = vmatmul.mubr.msk.f32.gmra.mrb[2].mxu0 %vm24_vm1, %v15_v10 }
  0x12   :  { %599 = vmatprep.mubr.msk.f32.mxu0 %vm711_vm0, %v712_v4 }
  0x15   :  { %600 = vmatmul.mubr.msk.f32.gmra.mrb[4].mxu0 %vm24_vm1, %v16_v11 }
  0x16   :  { %602 = vmatprep.mubr.msk.f32.mxu0 %vm711_vm0, %v712_v4 }
  0x19   :  { %603 = vmatmul.mubr.msk.f32.gmra.mrb[6].mxu0 %vm24_vm1, %v17_v12 }
  0x1a   :  { %605 = vmatprep.mubr.msk.f32.mxu0 %vm711_vm0, %v712_v4 }
  0x1d   :  { %606 = vmatmul.mubr.msk.f32.gmra.mrb[8].mxu0 %vm24_vm1, %v18_v13 }
  0x1e   :  { %643 = vmatprep.mubr.msk.f32.mxu0 %vm711_vm0, %v712_v4 }
  0xe0   :  { %v106_v15 = vpop.f32.mrb[0].mxu0 }
  0xe1   :  { %v595_v16 = vpop.f32.mrb[1].mxu0  ;;  %v130_v18 = vmax.f32 %v106_v15, 0.0 }
  0xe4   :  { %v111_v17 = vpop.f32.mrb[2].mxu0 }
  0xe5   :  { %v131_v19 = vmax.f32 %v111_v17, 0.0  ;;  %v598_v20 = vpop.f32.mrb[3].mxu0  ;;  %v316_v17 = vadd.f32 %v543_v9, %v309_v3 }
  0xe7   :  { %v665_v21 = vpack.c.bf16 %v131_v19, %v130_v18  ;;  %v310_v18 = vadd.f32 %v308_v6, %v298_v5 }
  0xe8   :  { %v116_v22 = vpop.f32.mrb[4].mxu0 }
  0xe9   :  { %v601_v23 = vpop.f32.mrb[5].mxu0  ;;  %666 = vmatprep.subr.bf16.mxu1 %v665_v21  ;;  %v132_v25 = vmax.f32 %v116_v22, 0.0 }
  0xea   :  { %668 = vmatpush3.bf16.msra.mxu1 %v665_v21 }
  0xec   :  { %v121_v24 = vpop.f32.mrb[6].mxu0 }
  0xed   :  { %v133_v26 = vmax.f32 %v121_v24, 0.0  ;;  %v604_v27 = vpop.f32.mrb[7].mxu0 }
  0xef   :  { %v669_v28 = vpack.c.bf16 %v133_v26, %v132_v25 }
  0xf0   :  { %v126_v29 = vpop.f32.mrb[8].mxu0 }
  0xf1   :  { %v134_v30 = vmax.f32 %v126_v29, 0.0  ;;  %670 = vmatprep.subr.bf16.mxu1 %v669_v28  ;;  %v607_v31 = vpop.f32.mrb[9].mxu0 }
  0xf2   :  { %672 = vmatpush3.bf16.msra.mxu1 %v669_v28  ;;  %v318_v31 = vmax.f32 %v316_v17, 0.0 }
  0xf3   :  { %616 = vmatprep.subr.mxu1 %v134_v30 }
  0xf6   :  { %617 = vmatpush3.msra.mxu1 %v134_v30 }
  0xf7   :  { %619 = vmatmul.mubr.msk.f32.vlgmr.msra.gmra.mrb[0].mxu1 %vm24_vm1, %v136_v32  ;;  %679 = vmatprep.subr.bf16.mxu1 %v710_v0  ;;  %v317_v32 = vadd.f32 %v543_v9, %v310_v18 }
  0xf8   :  { %621 = vmatprep.mubr.msk.f32.mxu1 %vm24_vm1, %v137_v33 }
  0xfb   :  { %622 = vmatmul.mubr.msk.f32.gmra.mrb[2].mxu1 %vm24_vm1, %v138_v34 }
  0xfc   :  { %624 = vmatprep.mubr.msk.f32.mxu1 %vm24_vm1, %v139_v35 }
  0xff   :  { %625 = vmatmul.mubr.msk.f32.gmra.mrb[4].mxu1 %vm24_vm1, %v140_v36  ;;  %v319_v36 = vmax.f32 %v317_v32, 0.0 }
 0x100   :  { %627 = vmatprep.mubr.msk.f32.mxu1 %vm24_vm1, %v141_v37 }
 0x103   :  { %628 = vmatmul.mubr.msk.f32.gmra.mrb[6].mxu1 %vm24_vm1, %v142_v38 }
 0x104   :  { %630 = vmatprep.mubr.msk.f32.mxu1 %vm24_vm1, %v143_v39 }
 0x107   :  { %631 = vmatmul.mubr.msk.f32.gmra.mrb[8].mxu1 %vm24_vm1, %v144_v40 }
 0x108   :  { %656 = vmatprep.mubr.msk.f32.mxu1 %vm711_vm0, %v712_v4 }
 0x1ca   :  { %v620_v41 = vpop.f32.mrb[0].mxu1 }
 0x1cb   :  { %v241_v42 = vpop.f32.mrb[1].mxu1 }
 0x1cc   :  { %v695_v43 = vpack.i.bf16 %v620_v41, %v241_v42 }
 0x1ce   :  { %v623_v44 = vpop.f32.mrb[2].mxu1 }
 0x1cf   :  { %v251_v45 = vpop.f32.mrb[3].mxu1 }
 0x1d0   :  { %v705_v46 = vpack.i.bf16 %v623_v44, %v251_v45 }
 0x1d2   :  { %v626_v47 = vpop.f32.mrb[4].mxu1 }
 0x1d3   :  { %v829_v48 = vpop.f32.mrb[5].mxu1 }
 0x1d6   :  { %v629_v49 = vpop.f32.mrb[6].mxu1 }
 0x1d7   :  { %v271_v50 = vpop.f32.mrb[7].mxu1 }
 0x1d8   :  { %v690_v51 = vpack.i.bf16 %v271_v50, %v626_v47 }
 0x1da   :  { %691 = vrot.lane.b32.xlu0 %v690_v51, %s713_s24  ;;  %v831_v52 = vpop.f32.mrb[8].mxu1 }
 0x1db   :  { %v281_v53 = vpop.f32.mrb[9].mxu1 }
 0x1dc   :  { %v700_v54 = vpack.i.bf16 %v281_v53, %v629_v49 }
 0x1de   :  { %696 = vrot.lane.b32.xlu0 %v695_v43, %s714_s25  ;;  %701 = vrot.lane.b32.xlu1 %v700_v54, %s713_s24 }
 0x1e2   :  { %333 = vrot.lane.b32.xlu0 %v831_v52, %s713_s24  ;;  %706 = vrot.lane.b32.xlu1 %v705_v46, %s714_s25 }
 0x1e6   :  { %434 = vrot.lane.b32.xlu1 %v829_v48, %s714_s25 }
 0x24c   :  { %v692_v63 = vpop.permute.xlu0 %691 }
 0x24d   :  { %v694_v1 = vunpack.i.h.bf16 %v692_v63  ;;  %v693_v2 = vunpack.i.l.bf16 %v692_v63 }
 0x24f   :  { %v342_v7 = vsel %vm340_vm2, %v620_v41, %v694_v1  ;;  %v341_v8 = vsel %vm340_vm2, %v241_v42, %v693_v2 }
 0x250   :  { %v674_v10 = vpack.c.bf16 %v342_v7, %v341_v8  ;;  %v697_v11 = vpop.permute.xlu0 %696  ;;  %v702_v12 = vpop.permute.xlu1 %701 }
 0x251   :  { %v699_v13 = vunpack.i.h.bf16 %v697_v11  ;;  %v698_v14 = vunpack.i.l.bf16 %v697_v11  ;;  %v704_v15 = vunpack.i.h.bf16 %v702_v12  ;;  %v703_v16 = vunpack.i.l.bf16 %v702_v12 }
 0x252   :  { %675 = vmatpush3.bf16.msra.mxu0 %v674_v10 }
 0x253   :  { %v442_v19 = vsel %vm340_vm2, %v699_v13, %v271_v50  ;;  %v441_v20 = vsel %vm340_vm2, %v698_v14, %v626_v47  ;;  %v344_v21 = vsel %vm340_vm2, %v623_v44, %v704_v15  ;;  %v343_v22 = vsel %vm340_vm2, %v251_v45, %v703_v16  ;;  %676 = vmatprep.subr.bf16.mxu0 %v710_v0 }
 0x254   :  { %v680_v23 = vpack.c.bf16 %v442_v19, %v441_v20  ;;  %v677_v24 = vpack.c.bf16 %v344_v21, %v343_v22  ;;  %v707_v25 = vpop.permute.xlu1 %706  ;;  %v334_v28 = vpop.permute.xlu0 %333 }
 0x255   :  { %v709_v26 = vunpack.i.h.bf16 %v707_v25  ;;  %v708_v27 = vunpack.i.l.bf16 %v707_v25  ;;  %v345_v34 = vsel %vm340_vm2, %v829_v48, %v334_v28 }
 0x256   :  { %678 = vmatpush3.bf16.msra.mxu0 %v677_v24  ;;  %681 = vmatpush3.bf16.msra.mxu1 %v680_v23 }
 0x257   :  { %v444_v29 = vsel %vm340_vm2, %v709_v26, %v281_v53  ;;  %v443_v30 = vsel %vm340_vm2, %v708_v27, %v629_v49  ;;  %641 = vmatprep.subr.mxu0 %v712_v4  ;;  %682 = vmatprep.subr.bf16.mxu1 %v710_v0 }
 0x258   :  { %v683_v33 = vpack.c.bf16 %v444_v29, %v443_v30  ;;  %v435_v35 = vpop.permute.xlu1 %434 }
 0x259   :  { %v445_v37 = vsel %vm340_vm2, %v435_v35, %v831_v52 }
 0x25a   :  { %642 = vmatpush3.msra.mxu0 %v345_v34  ;;  %684 = vmatpush3.bf16.msra.mxu1 %v683_v33 }
 0x25b   :  { %654 = vmatprep.subr.mxu1 %v712_v4  ;;  %644 = vmatmul.mubr.msk.f32.vlgmr.msra.gmra.mrb[10].mxu0 %vm24_vm1, %v318_v31 }
 0x25e   :  { %655 = vmatpush3.msra.mxu1 %v445_v37 }
 0x25f   :  { %657 = vmatmul.mubr.msk.f32.vlgmr.msra.gmra.mrb[10].mxu1 %vm24_vm1, %v319_v36 }
 0x32e   :  { %v415_v0 = vpop.f32.mrb[10].mxu0 }
 0x32f   :  { %420 = vst.msk [vmem:[%s883_s3] sm:$0xff] %vm419_vm3, %v415_v0  ;;  %v645_v38 = vpop.f32.mrb[11].mxu0 }
 0x332   :  { %v515_v39 = vpop.f32.mrb[10].mxu1 }
 0x333   :  { %519 = vst.msk [vmem:[%s883_s3 + $0x8] sm:$0xff] %vm419_vm3, %v515_v39  ;;  %v658_v4 = vpop.f32.mrb[11].mxu1 }

</bundles_post_ra>
